<compile_context>
chip_gen: v7x
topology: tpu7x:2x2x1
jax: 0.10.0
libtpu: 0.0.40
codegen_flags: <defaults>
</compile_context>

<pallas_src>
import jax
import jax.numpy as jnp
from jax.experimental import pallas as pl
from jax.experimental.pallas import tpu as pltpu


# ----------------------------------------------------------------------------
# Kernel: one MXU dot per tile, f32 accumulation.
# ----------------------------------------------------------------------------
def _eqlin_kernel(w_ref, x_ref, o_ref):
    o_ref[...] = jnp.dot(
        w_ref[...], x_ref[...], preferred_element_type=jnp.float32
    ).astype(o_ref.dtype)


def _round_up(x, mult):
    return -(-x // mult) * mult


def equivariant_linear(w, u, v, *, tm=None, tn=None,
                       compute_dtype=None,
                       vmem_limit_bytes=32 * 1024 * 1024):
    """Pallas forward of EquivariantLinear.

    Args:
      w: (out_dim, n + m) weight.
      u: (B, n, r) factor.
      v: (B, m, r) factor.
      compute_dtype: optional dtype (e.g. jnp.bfloat16) to cast operands to
        before the kernel; accumulation is always f32.
    Returns:
      (B, out_dim, r) = w @ concat([u, v], axis=1), batched over B.
    """
    B, n, r = u.shape
    _, m, _ = v.shape
    out_dim, K = w.shape
    assert K == n + m, f"weight inner dim {K} != n+m = {n + m}"

    out_dtype = jnp.result_type(w.dtype, u.dtype, v.dtype)
    if compute_dtype is not None:
        w = w.astype(compute_dtype)
        u = u.astype(compute_dtype)
        v = v.astype(compute_dtype)

    # Single lane-dense activation operand: concat fused on the host,
    # (batch, rank) collapsed onto the lane axis.
    BR = B * r
    uv = jnp.concatenate([u, v], axis=1)                  # (B, K, r)
    x2 = jnp.transpose(uv, (1, 0, 2)).reshape(K, BR)      # (K, B*r)

    itemsize = jnp.dtype(w.dtype).itemsize
    budget = int(0.75 * vmem_limit_bytes)

    def ws_bytes(tm_, tn_):
        # conservative: double-buffer every operand and the output tile
        return 2 * (tm_ * K + K * tn_ + tm_ * tn_) * itemsize

    # ---- tile selection ------------------------------------------------
    if tn is None:
        tn = BR                               # prefer fully-resident activations
    tn = min(tn, BR)

    if tm is None:
        tm = min(512, out_dim)
        # Ensure >=2 row blocks so both v7x TensorCores get work.
        if out_dim > 8 and pl.cdiv(out_dim, tm) < 2:
            tm = max(8, _round_up(pl.cdiv(out_dim, 2), 8))
    tm = min(tm, out_dim)

    # Shrink toward the VMEM budget (tm first, then tn), keeping sublane/lane
    # alignment (multiples of 8 / 128) or full-dimension blocks.
    while ws_bytes(tm, tn) > budget and tm > 8:
        tm = max(8, _round_up(tm // 2, 8))
    while ws_bytes(tm, tn) > budget and tn > 128:
        tn = max(128, _round_up(tn // 2, 128))

    R = pl.cdiv(out_dim, tm)
    C = pl.cdiv(BR, tn)

    # ---- pick which operand is streamed (redundant-DMA minimisation) ----
    bytes_w = out_dim * K * itemsize
    bytes_x = K * BR * itemsize
    cost_cols_inner = bytes_w + (bytes_x if C == 1 else R * bytes_x)
    cost_rows_inner = bytes_x + (bytes_w if R == 1 else C * bytes_w)
    cols_inner = cost_cols_inner <= cost_rows_inner

    if cols_inner:
        grid = (R, C)
        w_map = lambda i, j: (i, 0)
        x_map = lambda i, j: (0, j)
        o_map = lambda i, j: (i, j)
    else:
        grid = (C, R)
        w_map = lambda j, i: (i, 0)
        x_map = lambda j, i: (0, j)
        o_map = lambda j, i: (i, j)

    cost = pl.CostEstimate(
        flops=2 * out_dim * K * BR,
        transcendentals=0,
        bytes_accessed=(w.size + x2.size) * itemsize
        + out_dim * BR * jnp.dtype(out_dtype).itemsize,
    )

    out2 = pl.pallas_call(
        _eqlin_kernel,
        out_shape=jax.ShapeDtypeStruct((out_dim, BR), out_dtype),
        grid=grid,
        in_specs=[
            pl.BlockSpec((tm, K), w_map),     # weight row tile (full K)
            pl.BlockSpec((K, tn), x_map),     # activation column tile (full K)
        ],
        out_specs=pl.BlockSpec((tm, tn), o_map),
        compiler_params=pltpu.CompilerParams(
            dimension_semantics=("parallel", "parallel"),
            vmem_limit_bytes=vmem_limit_bytes,
        ),
        cost_estimate=cost,
    )(w, x2)

    # (out_dim, B*r) -> (B, out_dim, r)   (layout plumbing, plain JAX)
    return jnp.transpose(out2.reshape(out_dim, B, r), (1, 0, 2))


if __name__ == "__main__":
    B, n, m, r, out_dim = 2, 6, 8, 4, 16

    key = jax.random.PRNGKey(0)
    kw, ku, kv = jax.random.split(key, 3)
    w = jax.random.normal(kw, (out_dim, n + m), jnp.float32) / ((n + m) ** 0.5)
    u = jax.random.normal(ku, (B, n, r), jnp.float32)
    v = jax.random.normal(kv, (B, m, r), jnp.float32)

    out = equivariant_linear(w, u, v)
    jax.block_until_ready(out)

    # Reference: w @ cat([u, v], dim=1), batched.
    ref = jnp.einsum("ok,bkr->bor", w, jnp.concatenate([u, v], axis=1))
    assert out.shape == (B, out_dim, r)
    assert jnp.allclose(out, ref, rtol=1e-2, atol=1e-2)
    print("KERNEL_OK")
</pallas_src>

<mosaic_0001>
module attributes {stable_mosaic.version = 11 : i64} {
  func.func @_eqlin_kernel(%arg0: i32, %arg1: i32, %arg2: memref<8x14xf32, #tpu.memory_space<vmem>>, %arg3: memref<14x8xf32, #tpu.memory_space<vmem>>, %arg4: memref<8x8xf32, #tpu.memory_space<vmem>>) attributes {dimension_semantics = [#tpu.dimension_semantics<parallel>, #tpu.dimension_semantics<parallel>], iteration_bounds = array<i64: 2, 1>, scalar_prefetch = 0 : i64, scratch_operands = 0 : i64, tpu.core_type = #tpu.core_type<tc>, window_params = [{transform_indices = @transform_0, window_bounds = array<i64: 8, 14>}, {transform_indices = @transform_1, window_bounds = array<i64: 14, 8>}, {transform_indices = @transform_2, window_bounds = array<i64: 8, 8>}]} {
    %c0 = arith.constant 0 : index
    %c0_0 = arith.constant 0 : index
    %0 = vector.load %arg2[%c0, %c0_0] : memref<8x14xf32, #tpu.memory_space<vmem>>, vector<8x14xf32>
    %c0_1 = arith.constant 0 : index
    %c0_2 = arith.constant 0 : index
    %1 = vector.load %arg3[%c0_1, %c0_2] : memref<14x8xf32, #tpu.memory_space<vmem>>, vector<14x8xf32>
    %cst = arith.constant dense<0.000000e+00> : vector<8x8xf32>
    %2 = tpu.matmul %0, %1, %cst {dimension_numbers = #tpu.dot_dimension_numbers<[1], [0], [0], [1], [0, 0, 1, 1], [], []>} : vector<8x14xf32>, vector<14x8xf32>, vector<8x8xf32> -> vector<8x8xf32>
    %c0_3 = arith.constant 0 : index
    %c0_4 = arith.constant 0 : index
    %3 = vector.load %arg4[%c0_3, %c0_4] : memref<8x8xf32, #tpu.memory_space<vmem>>, vector<8x8xf32>
    tpu.vector_store %arg4[%c0_3, %c0_4], %2 {strides = array<i32>} : memref<8x8xf32, #tpu.memory_space<vmem>>, vector<8x8xf32>,
    return
  }
  func.func @transform_0(%arg0: i32, %arg1: i32) -> (i32, i32) {
    %c0_i32 = arith.constant 0 : i32
    %c0_i32_0 = arith.constant 0 : i32
    return %arg0, %c0_i32 : i32, i32
  }
  func.func @transform_1(%arg0: i32, %arg1: i32) -> (i32, i32) {
    %c0_i32 = arith.constant 0 : i32
    %c0_i32_0 = arith.constant 0 : i32
    return %c0_i32, %arg1 : i32, i32
  }
  func.func @transform_2(%arg0: i32, %arg1: i32) -> (i32, i32) {
    %c0_i32 = arith.constant 0 : i32
    return %arg0, %arg1 : i32, i32
  }
}

</mosaic_0001>

<bundles_post_ra>
// kernel: tpu_custom_call.1
= control target key start
LH: loop header
LB: loop body
LE: loop exit
PB: predicated region body
PF: predicated region fallthrough
CT: control target
= control target key end

     0   :  { %s443_s9 = smov 0   ;;  %s445_s10 = smov 0   ;;  %s482_s0 = inlined_call_operand.vmem [shape: f32[16,14], index: 0, kind: input, shape index: {}]   ;;  %s483_s1 = inlined_call_operand.vmem [shape: f32[14,8], index: 1, kind: input, shape index: {}]   ;;  %s484_s2 = inlined_call_operand.vmem [shape: f32[16,8], index: 2, kind: output, shape index: {}]  }
   0x1   :  { %s447_s11 = smov 0  }
   0x2 LB: > { %s24_s12 = sadd.s32 1, %s418_s10  ;;  %p351_p0 = scmp.ge.s32.totalorder %s422_s11, 1  ;;  %s422_s11 = sphi %s447_s11, %s12_s11   ;;  %s418_s10 = sphi %s445_s10, %s486_s10   ;;  %s414_s9 = sphi %s443_s9, %s485_s9  }
   0x3   : > { %p26_p1 = scmp.ge.s32.totalorder %s24_s12, 2  ;;  %p134_p2 = scmp.lt.s32.totalorder %s422_s11, 3 }
   0x5   : > { %s488_s12 = smov (%p26_p1, %s24_s12), 0  ;;  %p135_p3 = pnand %p351_p0, %p134_p2 }
   0x6   : > { %v177_v0 = vld [vmem:[%s483_s1] sm:$0xff] (!%p135_p3)  ;;  %v178_v1 = vld [vmem:[%s483_s1 + $0x8] sm:$0x3f] (!%p135_p3)  ;;  %vm183_vm0 = vcmask (!%p135_p3), 1045504   ;;  %v424_v2 = vmov (!%p135_p3), 0.0|0.0   ;;  %vm425_vm1 = vmmov (!%p135_p3), 1  }
   0x7   : > { %138 = sbr.rel (%p135_p3) target bundleno = 231 (0xe7), region = 28  ;;  %368 = vmatprep.subr.bf16.mxu0 (!%p135_p3), %v424_v2  ;;  %v369_v3 = vpack.c.bf16 (!%p135_p3), %v178_v1, %v177_v0  ;;  %vm370_vm2 = vmpackc.low (!%p135_p3), %vm183_vm0, %vm425_vm1  ;;  %p161_p4 = scmp.lt.s32.totalorder (!%p135_p3), %s414_s9, 1  ;;  %vm426_vm3 = vmmov (!%p135_p3), 0   ;;  %v427_v4 = vmov (!%p135_p3), 0.0   ;;  %vm179_vm4 = vcmask (!%p135_p3), 113664  }
   0x8   : > { %365 = vmatprep.mubr.msk.f32.mxu0 (!%p135_p3), %vm426_vm3, %v427_v4  ;;  %vm257_vm5 = vcmask (!%p135_p3), 64512  }
   0x9   : > { %371 = vmatpush3.bf16.msk.msra.mxu0 (!%p135_p3), %vm370_vm2, %v369_v3 }
   0xe   : > { %s490_s9 = smov (!%p161_p4, %s414_s9), 1 }
   0xf   : > { %s352_s17 = sshll.u32 %s490_s9, 3 }
  0x10   : > { %s164_s20 = scalar_lea.vmem %s482_s0, %s352_s17  ;;  %s175_s23 = scalar_lea.vmem %s484_s2, %s352_s17 }
  0x11   : > { %v176_v5 = vld [vmem:[%s164_s20] sm:$0xff] }
  0x12   : > { %366 = vmatmul.mubr.msk.f32.vlgmr.msra.gmra.mrb[0].mxu0 %vm179_vm4, %v176_v5 }
  0xe5   : > { %v253_v6 = vpop.f32.mrb[0].mxu0 }
  0xe6   : > { %258 = vst.msk [vmem:[%s175_s23] sm:$0xff] %vm257_vm5, %v253_v6  ;;  %v367_v7 = vpop.f32.mrb[1].mxu0 }
  0xe7 PF: > { %s12_s11 = sadd.s32 1, %s422_s11   ;;  %s485_s9 = smov %s418_s10 }
  0xe8   : > { %p9_p5 = scmp.ge.s32.totalorder %s12_s11, 4   ;;  %s486_s10 = smov %s488_s12 }
  0xea   :  { %11 = sbr.rel (!%p9_p5) target bundleno = 2 (0x2), region = 61 }

</bundles_post_ra>
